<compile_context>
chip_gen: v7x
topology: tpu7x:2x2x1
jax: 0.10.0
libtpu: 0.0.40
codegen_flags: <defaults>
</compile_context>

<pallas_src>
import functools

import jax
import jax.numpy as jnp
from jax.experimental import pallas as pl
from jax.experimental.pallas import tpu as pltpu


def _round_up(n: int, m: int) -> int:
    return ((n + m - 1) // m) * m


@functools.lru_cache(maxsize=1)
def _num_tensorcores() -> int:
    """TensorCores per chip sharing a 'parallel' grid (megacore chips get 2)."""
    try:
        kind = jax.devices()[0].device_kind.lower()
    except Exception:  # pragma: no cover - defensive; default to 1 TC.
        return 1
    for tag in ("v7", "v5p", "v4"):
        if tag in kind:
            return 2
    return 1


# --------------------------------------------------------------------------
# Kernel body: fc1 + ReLU + fused (mu|logvar) head on one batch tile.
# --------------------------------------------------------------------------
def encoder_kernel(x_ref, w1_ref, b1_ref, wh_ref, bh_ref, out_ref):
    # In-vreg bf16 cast of x (free VPU slot; avoids a wrapper-side cast pass).
    x = x_ref[...].astype(w1_ref.dtype)
    # fc1: bf16 MXU matmul, f32 accumulation; bias-add + ReLU in f32.
    h = jnp.dot(x, w1_ref[...], preferred_element_type=jnp.float32)
    h = jnp.maximum(h + b1_ref[...], 0.0)
    # Fused mu/logvar head over 128-padded lanes -> one lane-dense store.
    y = jnp.dot(h.astype(wh_ref.dtype), wh_ref[...],
                preferred_element_type=jnp.float32)
    out_ref[...] = (y + bh_ref[...]).astype(out_ref.dtype)


# --------------------------------------------------------------------------
# One-time weight repack (call once, reuse the result every forward step).
# --------------------------------------------------------------------------
def prepare_params(params, *, compute_dtype=jnp.bfloat16):
    """Repack PyTorch-layout (out, in) weights into kernel layout:
       - W1 transposed to (in, hidden_pad), zero-padded to 128-lane hidden
       - mu|logvar weights concatenated and padded to (hidden_pad, n_pad)
       - biases reshaped to (1, dim) f32
    """
    hidden_dim = params["w1"].shape[0]
    latent_dim = params["w_mu"].shape[0]

    h_pad = _round_up(hidden_dim, 128)          # lane-dense hidden activations
    n_heads = 2 * latent_dim
    n_pad = _round_up(n_heads, 128)             # lane-dense fused-head output

    w1_t = jnp.pad(params["w1"].T, ((0, 0), (0, h_pad - hidden_dim)))
    w1_t = w1_t.astype(compute_dtype)                          # (in, h_pad)
    b1 = jnp.pad(params["b1"], (0, h_pad - hidden_dim))
    b1 = b1.reshape(1, h_pad).astype(jnp.float32)

    w_heads = jnp.concatenate([params["w_mu"].T, params["w_logvar"].T], axis=1)
    w_heads = jnp.pad(w_heads,
                      ((0, h_pad - hidden_dim), (0, n_pad - n_heads)))
    w_heads = w_heads.astype(compute_dtype)                    # (h_pad, n_pad)
    b_heads = jnp.concatenate([params["b_mu"], params["b_logvar"]])
    b_heads = jnp.pad(b_heads, (0, n_pad - n_heads))
    b_heads = b_heads.reshape(1, n_pad).astype(jnp.float32)

    return {"w1_t": w1_t, "b1": b1, "w_heads": w_heads, "b_heads": b_heads}


# --------------------------------------------------------------------------
# Forward wrapper.
# --------------------------------------------------------------------------
@functools.partial(jax.jit, static_argnames=("latent_dim", "block_m"))
def encoder_forward(x, packed, *, latent_dim: int, block_m: int = 512):
    """x: (B, input_dim) f32. packed: output of prepare_params().
    Returns (mu, logvar), each (B, latent_dim) f32."""
    B, input_dim = x.shape
    w1_t, b1 = packed["w1_t"], packed["b1"]
    w_heads, b_heads = packed["w_heads"], packed["b_heads"]
    h_pad = w1_t.shape[1]
    n_pad = w_heads.shape[1]
    assert w1_t.shape[0] == input_dim

    # Batch tiling: balance tiles to the batch (waste bounded by the 8-row
    # sublane granule); Pallas handles the ragged last block, so no jnp.pad
    # pass over x is ever materialized.
    num_tiles = max(1, pl.cdiv(B, block_m))
    num_tc = _num_tensorcores()
    if num_tc > 1 and num_tiles < num_tc and B >= 8 * num_tc:
        num_tiles = num_tc          # give each TensorCore at least one tile
    tm = _round_up(pl.cdiv(B, num_tiles), 8)
    grid = (pl.cdiv(B, tm),)

    cost = pl.CostEstimate(
        flops=2 * B * (input_dim * h_pad + h_pad * n_pad),
        transcendentals=0,
        bytes_accessed=(x.size * x.dtype.itemsize
                        + w1_t.size * w1_t.dtype.itemsize
                        + w_heads.size * w_heads.dtype.itemsize
                        + b1.size * 4 + b_heads.size * 4
                        + B * n_pad * 4),
    )

    # Constant-index (grid-resident) inputs: single-buffer to halve their VMEM.
    resident = dict(pipeline_mode=pl.Buffered(buffer_count=1))

    out = pl.pallas_call(
        encoder_kernel,
        out_shape=jax.ShapeDtypeStruct((B, n_pad), jnp.float32),
        grid=grid,
        in_specs=[
            pl.BlockSpec((tm, input_dim), lambda i: (i, 0)),               # x
            pl.BlockSpec((input_dim, h_pad), lambda i: (0, 0), **resident),  # W1
            pl.BlockSpec((1, h_pad), lambda i: (0, 0), **resident),          # b1
            pl.BlockSpec((h_pad, n_pad), lambda i: (0, 0), **resident),      # W_heads
            pl.BlockSpec((1, n_pad), lambda i: (0, 0), **resident),          # b_heads
        ],
        out_specs=pl.BlockSpec((tm, n_pad), lambda i: (i, 0)),
        compiler_params=pltpu.CompilerParams(
            dimension_semantics=("parallel",),
        ),
        cost_estimate=cost,
    )(x, w1_t, b1, w_heads, b_heads)

    mu = out[:, :latent_dim]
    logvar = out[:, latent_dim:2 * latent_dim]
    return mu, logvar


def init_params(key, input_dim, hidden_dim, latent_dim):
    """Deterministic init mimicking nn.Linear's uniform(-1/sqrt(fan_in), ...)."""
    ks = jax.random.split(key, 6)

    def lin(kw, kb, out_f, in_f):
        bound = 1.0 / jnp.sqrt(in_f)
        w = jax.random.uniform(kw, (out_f, in_f), jnp.float32, -bound, bound)
        b = jax.random.uniform(kb, (out_f,), jnp.float32, -bound, bound)
        return w, b

    w1, b1 = lin(ks[0], ks[1], hidden_dim, input_dim)
    wmu, bmu = lin(ks[2], ks[3], latent_dim, hidden_dim)
    wlv, blv = lin(ks[4], ks[5], latent_dim, hidden_dim)
    return {"w1": w1, "b1": b1,
            "w_mu": wmu, "b_mu": bmu,
            "w_logvar": wlv, "b_logvar": blv}


if __name__ == "__main__":
    input_dim, hidden_dim, latent_dim = 32, 64, 16
    batch = 8

    key = jax.random.PRNGKey(0)
    kx, kp = jax.random.split(key)
    x = jax.random.normal(kx, (batch, input_dim), jnp.float32)
    params = init_params(kp, input_dim, hidden_dim, latent_dim)

    # One-time repack (steady-state forwards reuse `packed` with no weight
    # repack traffic).
    packed = prepare_params(params)
    packed = jax.block_until_ready(packed)

    mu, logvar = encoder_forward(x, packed, latent_dim=latent_dim)
    jax.block_until_ready((mu, logvar))

    # Pure-JAX f32 reference (same math as the PyTorch module). Tolerances
    # loosened because matmul operands are bf16 (accumulation stays f32).
    h_ref = jnp.maximum(x @ params["w1"].T + params["b1"], 0.0)
    mu_ref = h_ref @ params["w_mu"].T + params["b_mu"]
    lv_ref = h_ref @ params["w_logvar"].T + params["b_logvar"]
    assert mu.shape == (batch, latent_dim) and logvar.shape == (batch, latent_dim)
    assert jnp.allclose(mu, mu_ref, atol=3e-2, rtol=3e-2), "mu mismatch"
    assert jnp.allclose(logvar, lv_ref, atol=3e-2, rtol=3e-2), "logvar mismatch"

    print("KERNEL_OK")
</pallas_src>

<mosaic_0001>
module attributes {stable_mosaic.version = 11 : i64} {
  func.func @encoder_kernel(%arg0: i32, %arg1: memref<8x32xf32, #tpu.memory_space<vmem>>, %arg2: memref<32x128xbf16, #tpu.memory_space<vmem>>, %arg3: memref<1x128xf32, #tpu.memory_space<vmem>>, %arg4: memref<128x128xbf16, #tpu.memory_space<vmem>>, %arg5: memref<1x128xf32, #tpu.memory_space<vmem>>, %arg6: memref<8x128xf32, #tpu.memory_space<vmem>>) attributes {dimension_semantics = [#tpu.dimension_semantics<parallel>], iteration_bounds = array<i64: 1>, scalar_prefetch = 0 : i64, scratch_operands = 0 : i64, tpu.core_type = #tpu.core_type<tc>, window_params = [{transform_indices = @transform_0, window_bounds = array<i64: 8, 32>}, {pipeline_mode = #tpu.pipeline_mode<synchronous>, transform_indices = @transform_1, window_bounds = array<i64: 32, 128>}, {pipeline_mode = #tpu.pipeline_mode<synchronous>, transform_indices = @transform_2, window_bounds = array<i64: 1, 128>}, {pipeline_mode = #tpu.pipeline_mode<synchronous>, transform_indices = @transform_3, window_bounds = array<i64: 128, 128>}, {pipeline_mode = #tpu.pipeline_mode<synchronous>, transform_indices = @transform_4, window_bounds = array<i64: 1, 128>}, {transform_indices = @transform_5, window_bounds = array<i64: 8, 128>}]} {
    %c0 = arith.constant 0 : index
    %c0_0 = arith.constant 0 : index
    %0 = vector.load %arg1[%c0, %c0_0] : memref<8x32xf32, #tpu.memory_space<vmem>>, vector<8x32xf32>
    %1 = arith.truncf %0 : vector<8x32xf32> to vector<8x32xbf16>
    %c0_1 = arith.constant 0 : index
    %c0_2 = arith.constant 0 : index
    %2 = vector.load %arg2[%c0_1, %c0_2] : memref<32x128xbf16, #tpu.memory_space<vmem>>, vector<32x128xbf16>
    %cst = arith.constant dense<0.000000e+00> : vector<8x128xf32>
    %3 = tpu.matmul %1, %2, %cst {dimension_numbers = #tpu.dot_dimension_numbers<[1], [0], [0], [1], [0, 0, 1, 1], [], []>} : vector<8x32xbf16>, vector<32x128xbf16>, vector<8x128xf32> -> vector<8x128xf32>
    %c0_3 = arith.constant 0 : index
    %c0_4 = arith.constant 0 : index
    %4 = vector.load %arg3[%c0_3, %c0_4] : memref<1x128xf32, #tpu.memory_space<vmem>>, vector<1x128xf32>
    %5 = vector.broadcast %4 : vector<1x128xf32> to vector<8x128xf32>
    %6 = arith.addf %3, %5 : vector<8x128xf32>
    %cst_5 = arith.constant 0.000000e+00 : f32
    %7 = vector.broadcast %cst_5 : f32 to vector<8x128xf32>
    %8 = arith.maximumf %6, %7 : vector<8x128xf32>
    %9 = arith.truncf %8 : vector<8x128xf32> to vector<8x128xbf16>
    %c0_6 = arith.constant 0 : index
    %c0_7 = arith.constant 0 : index
    %10 = vector.load %arg4[%c0_6, %c0_7] : memref<128x128xbf16, #tpu.memory_space<vmem>>, vector<128x128xbf16>
    %cst_8 = arith.constant dense<0.000000e+00> : vector<8x128xf32>
    %11 = tpu.matmul %9, %10, %cst_8 {dimension_numbers = #tpu.dot_dimension_numbers<[1], [0], [0], [1], [0, 0, 1, 1], [], []>} : vector<8x128xbf16>, vector<128x128xbf16>, vector<8x128xf32> -> vector<8x128xf32>
    %c0_9 = arith.constant 0 : index
    %c0_10 = arith.constant 0 : index
    %12 = vector.load %arg5[%c0_9, %c0_10] : memref<1x128xf32, #tpu.memory_space<vmem>>, vector<1x128xf32>
    %13 = vector.broadcast %12 : vector<1x128xf32> to vector<8x128xf32>
    %14 = arith.addf %11, %13 : vector<8x128xf32>
    %c0_11 = arith.constant 0 : index
    %c0_12 = arith.constant 0 : index
    %15 = vector.load %arg6[%c0_11, %c0_12] : memref<8x128xf32, #tpu.memory_space<vmem>>, vector<8x128xf32>
    tpu.vector_store %arg6[%c0_11, %c0_12], %14 {strides = array<i32>} : memref<8x128xf32, #tpu.memory_space<vmem>>, vector<8x128xf32>,
    return
  }
  func.func @transform_0(%arg0: i32) -> (i32, i32) {
    %c0_i32 = arith.constant 0 : i32
    %c0_i32_0 = arith.constant 0 : i32
    return %arg0, %c0_i32 : i32, i32
  }
  func.func @transform_1(%arg0: i32) -> (i32, i32) {
    %c0_i32 = arith.constant 0 : i32
    %c0_i32_0 = arith.constant 0 : i32
    %c0_i32_1 = arith.constant 0 : i32
    return %c0_i32, %c0_i32_0 : i32, i32
  }
  func.func @transform_2(%arg0: i32) -> (i32, i32) {
    %c0_i32 = arith.constant 0 : i32
    %c0_i32_0 = arith.constant 0 : i32
    %c0_i32_1 = arith.constant 0 : i32
    return %c0_i32, %c0_i32_0 : i32, i32
  }
  func.func @transform_3(%arg0: i32) -> (i32, i32) {
    %c0_i32 = arith.constant 0 : i32
    %c0_i32_0 = arith.constant 0 : i32
    %c0_i32_1 = arith.constant 0 : i32
    return %c0_i32, %c0_i32_0 : i32, i32
  }
  func.func @transform_4(%arg0: i32) -> (i32, i32) {
    %c0_i32 = arith.constant 0 : i32
    %c0_i32_0 = arith.constant 0 : i32
    %c0_i32_1 = arith.constant 0 : i32
    return %c0_i32, %c0_i32_0 : i32, i32
  }
  func.func @transform_5(%arg0: i32) -> (i32, i32) {
    %c0_i32 = arith.constant 0 : i32
    %c0_i32_0 = arith.constant 0 : i32
    return %arg0, %c0_i32 : i32, i32
  }
}

</mosaic_0001>

<bundles_post_ra>
// kernel: encoder_forward.1
= control target key start
LH: loop header
LB: loop body
LE: loop exit
PB: predicated region body
PF: predicated region fallthrough
CT: control target
= control target key end

     0   :  { %10 = vsyncpa [#allocation3], 0  ;;  %s477_s0 = inlined_call_operand.hbm [shape: f32[8,32], index: 0, kind: input, shape index: {}]   ;;  %s478_s1 = inlined_call_operand.hbm [shape: bf16[32,128], index: 1, kind: input, shape index: {}]   ;;  %s479_s2 = inlined_call_operand.vmem [shape: f32[1,128], index: 2, kind: input, shape index: {}]   ;;  %s480_s3 = inlined_call_operand.hbm [shape: bf16[128,128], index: 3, kind: input, shape index: {}]   ;;  %s481_s4 = inlined_call_operand.vmem [shape: f32[1,128], index: 4, kind: input, shape index: {}]   ;;  %s482_s5 = inlined_call_operand.vmem [shape: f32[8,128], index: 5, kind: output, shape index: {}]  }
   0x1   :  { %11 = vsyncpa [#allocation5], 0  ;;  %s389_s18 = smov [#allocation4]   ;;  %s319_s22 = scalar_lea.hbm %s478_s1, 256 }
   0x2   :  { %s27_s19 = sshll.u32 %s389_s18, 4  ;;  %p320_p0 = scmp.ne.s32.totalorder %s478_s1, %s319_s22  ;;  %s28_s19 = int_to_ptr.vmem [resolvable:$true] %s27_s19 }
   0x3   :  { %p323_p1 = scmp.lt.u32.totalorder %s319_s22, %s478_s1 }
   0x5   :  { %p325_p2 = pnand %p323_p1, %p320_p0 }
   0x7   :  { %328 = shalt.err (!%p325_p2)
}
   0x8   :  { %s329_s27 = scalar_lea.vmem %s28_s19, 256  ;;  %p334_p4 = scmp.lt.s32.totalorder %s28_s19, %s28_s19 }
   0x9   :  { %p330_p3 = scmp.ne.s32.totalorder %s28_s19, %s329_s27  ;;  %p335_p5 = scmp.lt.s32.totalorder %s329_s27, %s329_s27 }
   0xb   :  { %p336_p6 = por %p335_p5, %p334_p4 }
   0xd   :  { %p337_p7 = pnand %p336_p6, %p330_p3 }
   0xf   :  { %340 = shalt.err (!%p337_p7)
}
  0x10   :  { %s390_s28 = smov 64   ;;  %s391_s29 = smov 4  }
  0x11   :  { %33 = dma.hbm_to_vmem [thread:$0]  %s478_s1, 256, %s28_s19, [#allocation5], %s390_s28, %s390_s28, %s391_s29  }
  0x12   :  { %s392_s7 = smov [#allocation2]   ;;  %s393_s9 = smov [#allocation6]  }
  0x13   :  { %s18_s8 = sshll.u32 %s392_s7, 4  ;;  %s41_s10 = sshll.u32 %s393_s9, 4  ;;  %s19_s8 = int_to_ptr.vmem [resolvable:$true] %s18_s8  ;;  %s42_s10 = int_to_ptr.vmem [resolvable:$true] %s41_s10 }
  0x14   :  { %s341_s13 = scalar_lea.hbm %s477_s0, 128 }
  0x15   :  { %p342_p8 = scmp.ne.s32.totalorder %s477_s0, %s341_s13  ;;  %p345_p9 = scmp.lt.u32.totalorder %s341_s13, %s477_s0 }
  0x17   :  { %p347_p10 = pnand %p345_p9, %p342_p8 }
  0x19   :  { %350 = shalt.err (!%p347_p10)
}
  0x1a   :  { %s351_s1 = scalar_lea.vmem %s19_s8, 128  ;;  %p356_p12 = scmp.lt.s32.totalorder %s19_s8, %s19_s8 }
  0x1b   :  { %p352_p11 = scmp.ne.s32.totalorder %s19_s8, %s351_s1  ;;  %p357_p13 = scmp.lt.s32.totalorder %s351_s1, %s351_s1 }
  0x1d   :  { %p358_p0 = por %p357_p13, %p356_p12 }
  0x1f   :  { %p359_p1 = pnand %p358_p0, %p352_p11 }
  0x21   :  { %362 = shalt.err (!%p359_p1)
}
  0x22   :  { %21 = dma.hbm_to_vmem [thread:$0]  %s477_s0, 128, %s19_s8, [#allocation3]  }
  0x23   :  { %s363_s22 = scalar_lea.hbm %s480_s3, 1024 }
  0x24   :  { %p364_p2 = scmp.ne.s32.totalorder %s480_s3, %s363_s22  ;;  %p367_p3 = scmp.lt.u32.totalorder %s363_s22, %s480_s3 }
  0x26   :  { %p369_p4 = pnand %p367_p3, %p364_p2 }
  0x28   :  { %372 = shalt.err (!%p369_p4)
}
  0x29   :  { %s373_s27 = scalar_lea.vmem %s42_s10, 1024  ;;  %p378_p6 = scmp.lt.s32.totalorder %s42_s10, %s42_s10 }
  0x2a   :  { %p374_p5 = scmp.ne.s32.totalorder %s42_s10, %s373_s27  ;;  %p379_p7 = scmp.lt.s32.totalorder %s373_s27, %s373_s27 }
  0x2c   :  { %p380_p8 = por %p379_p7, %p378_p6 }
  0x2e   :  { %p381_p9 = pnand %p380_p8, %p374_p5 }
  0x30   :  { %384 = shalt.err (!%p381_p9)
}
  0x31   :  { %47 = dma.hbm_to_vmem [thread:$0]  %s480_s3, 1024, %s42_s10, [#allocation5], %s390_s28, %s390_s28, %s391_s29  }
  0x32   :  { %385 = dma.done.wait [#allocation3], 128  }
  0x33   :  { %386 = vsyncadd [#allocation3], 4294967168 }
  0x34   :  { %387 = dma.done.wait [#allocation5], 1280  }
  0x35   :  { %388 = vsyncadd [#allocation5], 4294966016  ;;  %v394_v0 = vmov 0.0   ;;  %vm395_vm0 = vmmov 0   ;;  %v309_v1 = vld [vmem:[#allocation4] sm:$0xff]   ;;  %v310_v2 = vld [vmem:[#allocation4 + $0x8] sm:$0xff]  }
  0x36   :  { %274 = vmatprep.subr.bf16.mxu0 %v394_v0  ;;  %278 = vmatprep.mubr.msk.bf16.mxu0 %vm395_vm0, %v394_v0  ;;  %v60_v3 = vld [vmem:[#allocation2] sm:$0xff]  ;;  %v311_v4 = vld [vmem:[#allocation6] sm:$0xff]   ;;  %vm85_vm1 = vcmask 261120   ;;  %v313_v7 = vld [vmem:[#allocation6 + $0x10] sm:$0xff]  }
  0x37   :  { %282 = vmatprep.subr.bf16.mxu1 %v394_v0  ;;  %298 = vmatprep.mubr.msk.bf16.mxu1 %vm395_vm0, %v394_v0  ;;  %v61_v5 = vpack.c.bf16 %v60_v3, %v60_v3  ;;  %v312_v6 = vld [vmem:[#allocation6 + $0x8] sm:$0xff]   ;;  %v314_v8 = vld [vmem:[#allocation6 + $0x18] sm:$0xff]   ;;  %v315_v9 = vld [vmem:[#allocation6 + $0x20] sm:$0xff]  }
  0x38   :  { %275 = vmatpush3.bf16.msra.mxu0 %v309_v1  ;;  %283 = vmatpush3.bf16.msra.mxu1 %v311_v4  ;;  %v316_v10 = vld [vmem:[#allocation6 + $0x28] sm:$0xff]   ;;  %v317_v11 = vld [vmem:[#allocation6 + $0x30] sm:$0xff]   ;;  %v318_v12 = vld [vmem:[#allocation6 + $0x38] sm:$0xff]  }
  0x39   :  { %276 = vmatprep.subr.bf16.mxu0 %v394_v0  ;;  %284 = vmatprep.subr.bf16.mxu1 %v394_v0  ;;  %v249_v13 = vld [vmem:[%s479_s2] ss:$0 sm:$0xff] }
  0x3a   :  { %v253_v21 = vld [vmem:[%s481_s4] ss:$0 sm:$0xff] }
  0x3c   :  { %277 = vmatpush3.bf16.msra.mxu0 %v310_v2  ;;  %285 = vmatpush3.bf16.msra.mxu1 %v312_v6 }
  0x3d   :  { %286 = vmatprep.subr.bf16.mxu1 %v394_v0 }
  0x3f   :  { %279 = vmatmul.mubr.msk.bf16.vlgmr.msra.gmra.mrb[0].mxu0 %vm85_vm1, %v61_v5 }
  0x40   :  { %287 = vmatpush3.bf16.msra.mxu1 %v313_v7 }
  0x41   :  { %288 = vmatprep.subr.bf16.mxu1 %v394_v0 }
  0x44   :  { %289 = vmatpush3.bf16.msra.mxu1 %v314_v8 }
  0x45   :  { %290 = vmatprep.subr.bf16.mxu1 %v394_v0 }
  0x48   :  { %291 = vmatpush3.bf16.msra.mxu1 %v315_v9 }
  0x49   :  { %292 = vmatprep.subr.bf16.mxu1 %v394_v0 }
  0x4c   :  { %293 = vmatpush3.bf16.msra.mxu1 %v316_v10 }
  0x4d   :  { %294 = vmatprep.subr.bf16.mxu1 %v394_v0 }
  0x50   :  { %295 = vmatpush3.bf16.msra.mxu1 %v317_v11 }
  0x51   :  { %296 = vmatprep.subr.bf16.mxu1 %v394_v0 }
  0x54   :  { %297 = vmatpush3.bf16.msra.mxu1 %v318_v12 }
 0x112   :  { %v123_v14 = vpop.f32.mrb[0].mxu0 }
 0x113   :  { %v124_v15 = vadd.f32 %v249_v13, %v123_v14  ;;  %v280_v16 = vpop.f32.mrb[1].mxu0 }
 0x114   :  { %v126_v17 = vpop.f32.mrb[2].mxu0 }
 0x115   :  { %v129_v18 = vmax.f32 %v124_v15, 0.0  ;;  %v281_v19 = vpop.f32.mrb[3].mxu0 }
 0x117   :  { %v130_v20 = vpack.c.bf16 %v129_v18, %v129_v18 }
 0x119   :  { %299 = vmatmul.mubr.bf16.vlgmr.msra.gmra.mrb[0].mxu1 %v130_v20 }
 0x1ec   :  { %v236_v22 = vpop.f32.mrb[0].mxu1 }
 0x1ed   :  { %v237_v23 = vadd.f32 %v253_v21, %v236_v22  ;;  %v300_v24 = vpop.f32.mrb[1].mxu1 }
 0x1ee   :  { %v239_v25 = vpop.f32.mrb[2].mxu1 }
 0x1ef   :  { %242 = vst [vmem:[%s482_s5] sm:$0xff] %v237_v23  ;;  %v301_v26 = vpop.f32.mrb[3].mxu1 }
 0x1f0   :  { %247 = vsyncpa [#allocation3], 1 }
 0x1f1   :  { %248 = vsyncpa [#allocation5], 1 }

</bundles_post_ra>
